<compile_context>
chip_gen: v5e
topology: v5e:2x2
jax: 0.10.0
libtpu: 0.0.40
codegen_flags: <defaults>
</compile_context>

<pallas_src>
import jax
import jax.numpy as jnp
from jax.experimental import pallas as pl
from jax.experimental.pallas import tpu as pltpu


def _sobel_kernel(x_ref, o_ref):
    nb, H, W = x_ref.shape

    # Up-cast once; all arithmetic in f32 (v5e has no bf16 VALU/EUP).
    x = x_ref[...].astype(jnp.float32)

    # In-kernel zero pad (stays in VMEM/vregs — no HBM round-trip).
    zc = jnp.zeros((nb, H, 1), jnp.float32)
    zr = jnp.zeros((nb, 1, W + 2), jnp.float32)
    xp = jnp.concatenate([zc, x, zc], axis=2)      # (nb, H,   W+2)
    xp = jnp.concatenate([zr, xp, zr], axis=1)     # (nb, H+2, W+2)

    # Separable Sobel.
    # h[i, j] = x[i, j+1] - x[i, j-1]  (zero outside)
    h = xp[:, :, 2:] - xp[:, :, :W]                # (nb, H+2, W)
    gx = h[:, :H, :] + 2.0 * h[:, 1:H + 1, :] + h[:, 2:, :]

    # v[i, j] = x[i+1, j] - x[i-1, j]  (zero outside)
    v = xp[:, 2:, :] - xp[:, :H, :]                # (nb, H, W+2)
    gy = v[:, :, :W] + 2.0 * v[:, :, 1:W + 1] + v[:, :, 2:]

    o_ref[...] = jnp.sqrt(gx * gx + gy * gy + 1e-6).astype(o_ref.dtype)


def sobel_filter(img, *, vmem_block_budget_bytes=8 * 1024 * 1024):
    """img: (N, 1, H, W). Returns (N, 1, H, W) Sobel gradient magnitude."""
    N, C, H, W = img.shape
    assert C == 1, "SobelFilter conv weights have in_channels=1"

    x = img.reshape(N, H, W)  # layout-preserving, no copy

    # Pick Nb images per grid step: big enough to amortize per-step overhead,
    # small enough that (double-buffered in + out + f32 intermediates) fits the
    # per-block VMEM budget on all generations (v7x has only 64 MiB physical).
    per_img_resident = 10 * H * W * 4  # rough f32 footprint incl. intermediates
    nb = max(1, min(N, vmem_block_budget_bytes // per_img_resident))
    if N >= 2:
        nb = min(nb, N // 2)  # keep >= 2 grid steps: pipelining + megacore split
    nb = max(nb, 1)
    while N % nb:             # require an even grid
        nb -= 1

    out = pl.pallas_call(
        _sobel_kernel,
        out_shape=jax.ShapeDtypeStruct((N, H, W), img.dtype),
        grid_spec=pltpu.PrefetchScalarGridSpec(
            num_scalar_prefetch=0,
            grid=(N // nb,),
            in_specs=[pl.BlockSpec((nb, H, W), lambda b: (b, 0, 0))],
            out_specs=pl.BlockSpec((nb, H, W), lambda b: (b, 0, 0)),
        ),
        compiler_params=pltpu.CompilerParams(
            dimension_semantics=("parallel",),
            vmem_limit_bytes=32 * 1024 * 1024,
        ),
    )(x)

    return out.reshape(N, 1, H, W)


def _sobel_ref(img):
    """Pure-JAX reference matching the PyTorch forward."""
    x = img[:, 0, :, :].astype(jnp.float32)
    xp = jnp.pad(x, ((0, 0), (1, 1), (1, 1)))
    H, W = x.shape[1], x.shape[2]

    def s(di, dj):
        return xp[:, di:di + H, dj:dj + W]

    gx = -s(0, 0) + s(0, 2) - 2 * s(1, 0) + 2 * s(1, 2) - s(2, 0) + s(2, 2)
    gy = -s(0, 0) - 2 * s(0, 1) - s(0, 2) + s(2, 0) + 2 * s(2, 1) + s(2, 2)
    return jnp.sqrt(gx * gx + gy * gy + 1e-6)[:, None, :, :].astype(img.dtype)


if __name__ == "__main__":
    key = jax.random.PRNGKey(0)
    N, C, H, W = 2, 1, 16, 16
    img = jax.random.normal(key, (N, C, H, W), dtype=jnp.float32)

    out = sobel_filter(img)
    out = jax.block_until_ready(out)

    ref = _sobel_ref(img)
    assert out.shape == (N, C, H, W)
    assert jnp.allclose(out, ref, atol=1e-5, rtol=1e-5)

    print("KERNEL_OK")
</pallas_src>

<mosaic_0001>
module attributes {stable_mosaic.version = 11 : i64} {
  func.func @_sobel_kernel(%arg0: i32, %arg1: memref<1x16x16xf32, #tpu.memory_space<vmem>>, %arg2: memref<1x16x16xf32, #tpu.memory_space<vmem>>) attributes {dimension_semantics = [#tpu.dimension_semantics<parallel>], iteration_bounds = array<i64: 2>, scalar_prefetch = 0 : i64, scratch_operands = 0 : i64, tpu.core_type = #tpu.core_type<tc>, window_params = [{transform_indices = @transform_0, window_bounds = array<i64: 1, 16, 16>}, {transform_indices = @transform_1, window_bounds = array<i64: 1, 16, 16>}]} {
    %c0 = arith.constant 0 : index
    %c0_0 = arith.constant 0 : index
    %c0_1 = arith.constant 0 : index
    %0 = vector.load %arg1[%c0, %c0_0, %c0_1] : memref<1x16x16xf32, #tpu.memory_space<vmem>>, vector<1x16x16xf32>
    %cst = arith.constant 0.000000e+00 : f32
    %1 = vector.broadcast %cst : f32 to vector<1x16x1xf32>
    %cst_2 = arith.constant 0.000000e+00 : f32
    %2 = vector.broadcast %cst_2 : f32 to vector<1x1x18xf32>
    %3 = tpu.concatenate %1, %0, %1 in 2 : vector<1x16x1xf32>, vector<1x16x16xf32>, vector<1x16x1xf32> -> vector<1x16x18xf32>
    %4 = tpu.concatenate %2, %3, %2 in 1 : vector<1x1x18xf32>, vector<1x16x18xf32>, vector<1x1x18xf32> -> vector<1x18x18xf32>
    %5 = vector.extract_strided_slice %4 {offsets = [0, 0, 2], sizes = [1, 18, 16], strides = [1, 1, 1]} : vector<1x18x18xf32> to vector<1x18x16xf32>
    %6 = vector.extract_strided_slice %4 {offsets = [0, 0, 0], sizes = [1, 18, 16], strides = [1, 1, 1]} : vector<1x18x18xf32> to vector<1x18x16xf32>
    %7 = arith.subf %5, %6 : vector<1x18x16xf32>
    %8 = vector.extract_strided_slice %7 {offsets = [0, 0, 0], sizes = [1, 16, 16], strides = [1, 1, 1]} : vector<1x18x16xf32> to vector<1x16x16xf32>
    %9 = vector.extract_strided_slice %7 {offsets = [0, 1, 0], sizes = [1, 16, 16], strides = [1, 1, 1]} : vector<1x18x16xf32> to vector<1x16x16xf32>
    %cst_3 = arith.constant 2.000000e+00 : f32
    %10 = vector.broadcast %cst_3 : f32 to vector<1x16x16xf32>
    %11 = arith.mulf %10, %9 : vector<1x16x16xf32>
    %12 = arith.addf %8, %11 : vector<1x16x16xf32>
    %13 = vector.extract_strided_slice %7 {offsets = [0, 2, 0], sizes = [1, 16, 16], strides = [1, 1, 1]} : vector<1x18x16xf32> to vector<1x16x16xf32>
    %14 = arith.addf %12, %13 : vector<1x16x16xf32>
    %15 = vector.extract_strided_slice %4 {offsets = [0, 2, 0], sizes = [1, 16, 18], strides = [1, 1, 1]} : vector<1x18x18xf32> to vector<1x16x18xf32>
    %16 = vector.extract_strided_slice %4 {offsets = [0, 0, 0], sizes = [1, 16, 18], strides = [1, 1, 1]} : vector<1x18x18xf32> to vector<1x16x18xf32>
    %17 = arith.subf %15, %16 : vector<1x16x18xf32>
    %18 = vector.extract_strided_slice %17 {offsets = [0, 0, 0], sizes = [1, 16, 16], strides = [1, 1, 1]} : vector<1x16x18xf32> to vector<1x16x16xf32>
    %19 = vector.extract_strided_slice %17 {offsets = [0, 0, 1], sizes = [1, 16, 16], strides = [1, 1, 1]} : vector<1x16x18xf32> to vector<1x16x16xf32>
    %cst_4 = arith.constant 2.000000e+00 : f32
    %20 = vector.broadcast %cst_4 : f32 to vector<1x16x16xf32>
    %21 = arith.mulf %20, %19 : vector<1x16x16xf32>
    %22 = arith.addf %18, %21 : vector<1x16x16xf32>
    %23 = vector.extract_strided_slice %17 {offsets = [0, 0, 2], sizes = [1, 16, 16], strides = [1, 1, 1]} : vector<1x16x18xf32> to vector<1x16x16xf32>
    %24 = arith.addf %22, %23 : vector<1x16x16xf32>
    %25 = arith.mulf %14, %14 : vector<1x16x16xf32>
    %26 = arith.mulf %24, %24 : vector<1x16x16xf32>
    %27 = arith.addf %25, %26 : vector<1x16x16xf32>
    %cst_5 = arith.constant 9.99999997E-7 : f32
    %28 = vector.broadcast %cst_5 : f32 to vector<1x16x16xf32>
    %29 = arith.addf %27, %28 : vector<1x16x16xf32>
    %30 = math.sqrt %29 : vector<1x16x16xf32>
    %c0_6 = arith.constant 0 : index
    %c0_7 = arith.constant 0 : index
    %c0_8 = arith.constant 0 : index
    %31 = vector.load %arg2[%c0_6, %c0_7, %c0_8] : memref<1x16x16xf32, #tpu.memory_space<vmem>>, vector<1x16x16xf32>
    tpu.vector_store %arg2[%c0_6, %c0_7, %c0_8], %30 {strides = array<i32>} : memref<1x16x16xf32, #tpu.memory_space<vmem>>, vector<1x16x16xf32>,
    return
  }
  func.func @transform_0(%arg0: i32) -> (i32, i32, i32) {
    %c0_i32 = arith.constant 0 : i32
    %c0_i32_0 = arith.constant 0 : i32
    %c0_i32_1 = arith.constant 0 : i32
    return %arg0, %c0_i32, %c0_i32_0 : i32, i32, i32
  }
  func.func @transform_1(%arg0: i32) -> (i32, i32, i32) {
    %c0_i32 = arith.constant 0 : i32
    %c0_i32_0 = arith.constant 0 : i32
    %c0_i32_1 = arith.constant 0 : i32
    return %arg0, %c0_i32, %c0_i32_0 : i32, i32, i32
  }
}

</mosaic_0001>

<bundles_post_ra>
// kernel: tpu_custom_call.1
= control target key start
LH: loop header
LB: loop body
LE: loop exit
PB: predicated region body
PF: predicated region fallthrough
CT: control target
= control target key end

     0   :  { %6 = vsyncpa [#allocation3], 0  ;;  %s732_s0 = inlined_call_operand.hbm [shape: f32[2,16,16], index: 0, kind: input, shape index: {}]   ;;  %s733_s1 = inlined_call_operand.hbm [shape: f32[2,16,16], index: 1, kind: output, shape index: {}]  }
   0x1   :  { %8 = vsyncpa [#allocation3 + $0x1], 0 }
   0x2   :  { %9 = vsyncpa [#allocation4], 0 }
   0x3   :  { %11 = vsyncpa [#allocation4 + $0x1], 0  ;;  %s587_s6 = smov 0   ;;  %s589_s7 = smov 0  }
   0x4   :  { %s591_s8 = smov 0   ;;  %s593_s9 = smov 0  }
   0x5 LB: > { %s608_s10 = sadd.s32 4294967295, %s567_s9   ;;  %s397_s11 = sadd.s32 4294967294, %s567_s9   ;;  %s567_s9 = sphi %s593_s9, %s743_s9   ;;  %s563_s8 = sphi %s591_s8, %s742_s8   ;;  %s559_s7 = sphi %s589_s7, %s741_s7   ;;  %s555_s6 = sphi %s587_s6, %s740_s6  }
   0x6   : > { %s612_s12 = sadd.s32 1, %s567_s9   ;;  %s24_s13 = sadd.s32 1, %s563_s8 }
   0x7   : > { %s21_s14 = ssub.s32 %s567_s9, %s612_s12  ;;  %p31_p0 = scmp.ne.s32.totalorder %s563_s8, %s559_s7 }
   0x8   : > { %p22_p1 = scmp.eq.s32.totalorder %s21_s14, 0  ;;  %p32_p2 = scmp.eq.s32.totalorder %s567_s9, 0 }
   0x9   : > { %p37_p3 = scmp.ne.s32.totalorder %s559_s7, %s555_s6  ;;  %p38_p4 = scmp.eq.s32.totalorder %s608_s10, 0 }
   0xa   : > { %s624_s15 = scalar_select %p22_p1, %s563_s8, %s24_s13  }
   0xb   : > { %p626_p5 = por %p32_p2, %p31_p0  ;;  %p630_p6 = por %p38_p4, %p37_p3 }
   0xc   : > { %p61_p7 = scmp.eq.s32.totalorder %s608_s10, 1  ;;  %p67_p8 = scmp.eq.s32.totalorder %s397_s11, 1 }
   0xd   : > { %p425_p10 = scmp.lt.s32.totalorder %s567_s9, 2  ;;  %s87_s20 = sand.u32 1, %s563_s8  }
   0xe   : > { %p637_p11 = por %p61_p7, %p31_p0  ;;  %p641_p12 = por %p67_p8, %p37_p3 }
   0xf   : > { %s411_s21 = sshll.u32 %s567_s9, 4  ;;  %s400_s22 = sshll.u32 %s87_s20, 4 }
  0x10   : > { %s96_s25 = scalar_lea.hbm %s732_s0, %s411_s21  ;;  %s91_s27 = scalar_lea.vmem [#allocation2], %s400_s22 }
  0x11   : > { %s97_s26 = sshll.u32 %s96_s25, 4  ;;  %s99_s28 = sshll.u32 %s91_s27, 4  ;;  %s98_s26 = int_to_ptr.hbm [resolvable:$true] %s97_s26  ;;  %s100_s28 = int_to_ptr.vmem [resolvable:$true] %s99_s28 }
  0x12   : > { %p652_p13 = pnand %p425_p10, %p626_p5  ;;  %p403_p0 = scmp.ge.s32.totalorder %s567_s9, 1 }
  0x13   : > { %p107_p1 = scmp.lt.s32.totalorder %s567_s9, 3  ;;  %s88_s30 = scalar_lea.sflag [#allocation3], %s87_s20 }
  0x14   : > { %s471_s2 = sshra.s32 %s98_s26, 4  ;;  %p475_p3 = pneg %p652_p13  ;;  %s472_s2 = int_to_ptr.hbm [resolvable:$true] %s471_s2 }
  0x15   : > { %s473_s3 = scalar_lea.hbm %s472_s2, 16  ;;  %s478_s11 = scalar_lea.hbm %s732_s0, 32 }
  0x16   : > { %p474_p2 = scmp.ne.s32.totalorder %s472_s2, %s473_s3  ;;  %p479_p5 = scmp.lt.s32.totalorder %s472_s2, %s732_s0 }
  0x17   : > { %p480_p8 = scmp.lt.s32.totalorder %s478_s11, %s473_s3 }
  0x18   : > { %p476_p4 = pnand %p475_p3, %p474_p2 }
  0x19   : > { %p481_p10 = por %p480_p8, %p479_p5 }
  0x1a   : > { %p477_p7 = pneg %p476_p4 }
  0x1c   : > { %p482_p9 = pnand %p481_p10, %p477_p7 }
  0x1e   : > { %485 = shalt.err (!%p482_p9)
}
  0x1f   : > { %s569_s16 = smov 128   ;;  %s570_s20 = smov 8  }
  0x20   : > { %420 = dma.hbm_to_vmem [thread:$0]  (!%p652_p13), %s98_s26, 256, %s100_s28, %s88_s30, %s569_s16, %s569_s16, %s570_s20  }
  0x21   : > { %p108_p2 = pnand %p403_p0, %p107_p1 }
  0x22   : > { %s673_s21 = sand.u32 (!%p108_p2), 1, %s559_s7  }
  0x23   : > { %111 = sbr.rel (%p108_p2) target bundleno = 542 (0x21e), region = 24  ;;  %s404_s22 = sshll.u32 (!%p108_p2), %s673_s21, 4 }
  0x24   : > { %s114_s23 = scalar_lea.sflag (!%p108_p2), [#allocation3], %s673_s21  ;;  %s117_s24 = scalar_lea.vmem (!%p108_p2), [#allocation2], %s404_s22 }
  0x28   : > { %546 = dma.done.wait (%p630_p6), %s114_s23, 256  }
  0x29   : > { %548 = vsyncadd (%p630_p6), %s114_s23, 4294967040  ;;  %v137_v0 = vld [vmem:[%s117_s24] sm:$0xff]  ;;  %s571_s25 = smov 1   ;;  %v138_v1 = vld [vmem:[%s117_s24 + $0x8] sm:$0xff]  ;;  %vm147_vm0 = vcmask 7168   ;;  %vm150_vm1 = vcmask 138240  }
  0x2a   : > { %141 = vrot.lane.b32.xlu0 %v137_v0, %s571_s25  ;;  %vm155_vm2 = vcmask 1040384   ;;  %s572_s17 = smov 127   ;;  %vm207_vm3 = vcmask 1041408   ;;  %s573_s26 = smov 126   ;;  %vm197_vm4 = vcmask 1045504   ;;  %vm184_vm5 = vcmask 1046528  }
  0x2b   : > { %s574_s27 = smov 2   ;;  %s412_s28 = sshll.u32 %s608_s10, 4  ;;  %vm305_vm10 = vcmask 130048  }
  0x2c   : > { %s320_s2 = scalar_lea.hbm %s733_s1, %s412_s28  ;;  %s136_s3 = scalar_lea.vmem [#allocation5], %s404_s22 }
  0x2d   : > { %s321_s4 = sshll.u32 %s136_s3, 4  ;;  %s323_s5 = sshll.u32 %s320_s2, 4  ;;  %s322_s4 = int_to_ptr.vmem [resolvable:$true] %s321_s4  ;;  %s324_s5 = int_to_ptr.hbm [resolvable:$true] %s323_s5 }
  0x2e   : > { %s309_s11 = scalar_lea.sflag [#allocation4], %s673_s21  ;;  %s515_s13 = sshra.s32 %s324_s5, 4  ;;  %s516_s13 = int_to_ptr.hbm [resolvable:$true] %s515_s13 }
  0x2f   : > { %s517_s10 = scalar_lea.hbm %s516_s13, 16  ;;  %s521_s20 = scalar_lea.hbm %s733_s1, 32 }
  0x30   : > { %p518_p6 = scmp.ne.s32.totalorder %s516_s13, %s517_s10  ;;  %p522_p0 = scmp.lt.s32.totalorder %s516_s13, %s733_s1 }
  0x31   : > { %p523_p1 = scmp.lt.s32.totalorder %s521_s20, %s517_s10 }
  0x32   : > { %143 = vrot.lane.b32.xlu0 %v138_v1, %s571_s25  ;;  %p519_p9 = pnand %p518_p6, %p637_p11 }
  0x33   : > { %p524_p3 = por %p523_p1, %p522_p0 }
  0x34   : > { %p520_p13 = pneg %p519_p9 }
  0x36   : > { %p525_p4 = pnand %p524_p3, %p520_p13 }
  0x9c   : > { %v142_v2 = vpop.permute.xlu0 %141 }
  0x9d   : > { %v148_v3 = vsel %vm147_vm0, 0.0, %v142_v2 }
  0x9e   : > { %v151_v4 = vsel %vm150_vm1, %v148_v3, 0.0 }
  0x9f   : > { %v156_v5 = vrot.slane %v151_v4, 7 }
  0xa1   : > { %v162_v6 = vsel %vm155_vm2, 0.0, %v156_v5 }
  0xa2   : > { %v208_v7 = vrot.slane %v162_v6, 6 }
  0xa4   : > { %v144_v8 = vpop.permute.xlu0 %143  ;;  %v214_v9 = vsub.f32 %v162_v6, %v208_v7 }
  0xa5   : > { %v149_v10 = vsel %vm147_vm0, 0.0, %v144_v8 }
  0xa6   : > { %v152_v11 = vsel %vm150_vm1, %v149_v10, 0.0  ;;  %v217_v12 = vmul.f32 2.0, %v214_v9 }
  0xa7   : > { %v157_v13 = vrot.slane %v152_v11, 7 }
  0xa8   : > { %223 = vrot.lane.b32.xlu1 %v217_v12, %s572_s17 }
  0xa9   : > { %v158_v14 = vsel %vm155_vm2, %v156_v5, %v157_v13  ;;  %v163_v16 = vsel %vm155_vm2, %v157_v13, 0.0 }
  0xaa   : > { %v209_v15 = vrot.slane %v158_v14, 6 }
  0xac   : > { %v210_v17 = vsel %vm207_vm3, %v208_v7, %v209_v15  ;;  %v216_v18 = vsub.f32 %v163_v16, %v209_v15 }
  0xad   : > { %v215_v19 = vsub.f32 %v158_v14, %v210_v17 }
  0xae   : > { %v219_v20 = vmul.f32 2.0, %v216_v18 }
  0xaf   : > { %240 = vrot.lane.b32.xlu0 %v215_v19, %s573_s26  ;;  %v218_v21 = vmul.f32 2.0, %v215_v19 }
  0xb0   : > { %227 = vrot.lane.b32.xlu2 %v219_v20, %s572_s17 }
  0xb1   : > { %225 = vrot.lane.b32.xlu1 %v218_v21, %s572_s17 }
  0xb7   : > { %168 = vrot.lane.b32.xlu0 %v158_v14, %s574_s27 }
  0xb8   : > { %238 = vrot.lane.b32.xlu2 %v214_v9, %s573_s26 }
  0xb9   : > { %242 = vrot.lane.b32.xlu1 %v216_v18, %s573_s26 }
  0xc0   : > { %166 = vrot.lane.b32.xlu2 %v162_v6, %s574_s27 }
  0xc1   : > { %170 = vrot.lane.b32.xlu1 %v163_v16, %s574_s27 }
 0x10a   : > { %v228_v22 = vpop.permute.xlu2 %227 }
 0x10b   : > { %v234_v33 = vadd.f32 %v228_v22, %v216_v18 }
 0x112   : > { %v239_v25 = vpop.permute.xlu2 %238 }
 0x11a   : > { %v224_v23 = vpop.permute.xlu1 %223  ;;  %v167_v43 = vpop.permute.xlu2 %166 }
 0x11b   : > { %v232_v24 = vadd.f32 %v224_v23, %v214_v9  ;;  %v175_v45 = vsub.f32 %v162_v6, %v167_v43 }
 0x11d   : > { %v247_v26 = vadd.f32 %v239_v25, %v232_v24  ;;  %v178_v47 = vmul.f32 2.0, %v175_v45  ;;  %v198_v53 = vrot.slane %v175_v45, 2 }
 0x11f   : > { %v252_v30 = vmul.f32 %v247_v26, %v247_v26  ;;  %v185_v49 = vrot.slane %v178_v47, 1 }
 0x121   : > { %v241_v29 = vpop.permute.xlu0 %240  ;;  %v258_v34 = vrot.slane %v252_v30, 2 }
 0x123   : > { %v226_v27 = vpop.permute.xlu1 %225 }
 0x124   : > { %v233_v28 = vadd.f32 %v226_v27, %v215_v19 }
 0x126   : > { %v248_v31 = vadd.f32 %v241_v29, %v233_v28 }
 0x128   : > { %v253_v32 = vmul.f32 %v248_v31, %v248_v31 }
 0x129   : > { %v169_v42 = vpop.permute.xlu0 %168 }
 0x12a   : > { %v259_v35 = vrot.slane %v253_v32, 2  ;;  %v176_v44 = vsub.f32 %v158_v14, %v169_v42 }
 0x12b   : > { %v243_v36 = vpop.permute.xlu1 %242 }
 0x12c   : > { %v249_v37 = vadd.f32 %v243_v36, %v234_v33  ;;  %v260_v38 = vsel %vm197_vm4, %v258_v34, %v259_v35  ;;  %v179_v46 = vmul.f32 2.0, %v176_v44  ;;  %v199_v51 = vrot.slane %v176_v44, 2 }
 0x12d   : > { %263 = vrot.lane.b32.xlu2 %v260_v38, %s574_s27 }
 0x12e   : > { %v254_v39 = vmul.f32 %v249_v37, %v249_v37  ;;  %v186_v48 = vrot.slane %v179_v46, 1  ;;  %v200_v54 = vsel %vm197_vm4, %v198_v53, %v199_v51 }
 0x130   : > { %v261_v40 = vrot.slane %v254_v39, 2  ;;  %v187_v50 = vsel %vm184_vm5, %v185_v49, %v186_v48 }
 0x131   : > { %v192_v52 = vadd.f32 %v187_v50, %v175_v45 }
 0x132   : > { %v262_v41 = vsel %vm197_vm4, %v259_v35, %v261_v40 }
 0x133   : > { %265 = vrot.lane.b32.xlu0 %v262_v41, %s574_s27  ;;  %v205_v55 = vadd.f32 %v200_v54, %v192_v52  ;;  %v171_v59 = vpop.permute.xlu1 %170 }
 0x134   : > { %v177_v61 = vsub.f32 %v163_v16, %v171_v59 }
 0x135   : > { %v250_v56 = vmul.f32 %v205_v55, %v205_v55 }
 0x136   : > { %v180_v62 = vmul.f32 2.0, %v177_v61  ;;  %v201_v6 = vrot.slane %v177_v61, 2 }
 0x138   : > { %v188_v1 = vrot.slane %v180_v62, 1  ;;  %v202_v12 = vsel %vm197_vm4, %v199_v51, %v201_v6 }
 0x13a   : > { %v189_v5 = vsel %vm184_vm5, %v186_v48, %v188_v1 }
 0x13b   : > { %v193_v8 = vadd.f32 %v189_v5, %v176_v44 }
 0x13d   : > { %v206_v14 = vadd.f32 %v202_v12, %v193_v8 }
 0x13f   : > { %v251_v15 = vmul.f32 %v206_v14, %v206_v14 }
 0x187   : > { %v264_v57 = vpop.permute.xlu2 %263 }
 0x188   : > { %v269_v58 = vadd.f32 %v264_v57, %v250_v56 }
 0x18a   : > { %v271_v60 = vadd.f32 1e-06, %v269_v58 }
 0x18c   : > { %467 = vrsqrt.f32 %v271_v60  ;;  %vm280_vm6 = vcmp.eq.f32.partialorder %v271_v60, inf  ;;  %v283_v10 = vand.u32 2147483648, %v271_v60  ;;  %vm282_vm7 = vcmp.eq.f32.partialorder %v271_v60, 0.0 }
 0x192   : > { %v468_v63 = vpop.eup %467 }
 0x193   : > { %v274_v0 = vmul.f32 %v468_v63, %v271_v60 }
 0x195   : > { %v275_v2 = vmul.f32 %v468_v63, %v274_v0 }
 0x197   : > { %v276_v3 = vmul.f32 0.5, %v275_v2 }
 0x199   : > { %v277_v4 = vsub.f32 1.5, %v276_v3 }
 0x19b   : > { %v278_v7 = vmul.f32 %v468_v63, %v277_v4 }
 0x19d   : > { %v279_v9 = vmul.f32 %v278_v7, %v271_v60 }
 0x19f   : > { %v281_v11 = vsel %vm280_vm6, %v271_v60, %v279_v9 }
 0x1a0   : > { %v284_v13 = vsel %vm282_vm7, %v283_v10, %v281_v11 }
 0x1a1   : > { %299 = vrot.lane.b32.xlu1 %v284_v13, %s573_s26 }
 0x1a5   : > { %v266_v16 = vpop.permute.xlu0 %265 }
 0x1a6   : > { %v270_v17 = vadd.f32 %v266_v16, %v251_v15 }
 0x1a8   : > { %v272_v18 = vadd.f32 1e-06, %v270_v17 }
 0x1aa   : > { %469 = vrsqrt.f32 %v272_v18  ;;  %vm292_vm8 = vcmp.eq.f32.partialorder %v272_v18, inf  ;;  %v295_v26 = vand.u32 2147483648, %v272_v18  ;;  %vm294_vm9 = vcmp.eq.f32.partialorder %v272_v18, 0.0 }
 0x1b0   : > { %v470_v19 = vpop.eup %469 }
 0x1b1   : > { %v286_v20 = vmul.f32 %v470_v19, %v272_v18 }
 0x1b3   : > { %v287_v21 = vmul.f32 %v470_v19, %v286_v20 }
 0x1b5   : > { %v288_v22 = vmul.f32 0.5, %v287_v21 }
 0x1b7   : > { %v289_v23 = vsub.f32 1.5, %v288_v22 }
 0x1b9   : > { %v290_v24 = vmul.f32 %v470_v19, %v289_v23 }
 0x1bb   : > { %v291_v25 = vmul.f32 %v290_v24, %v272_v18 }
 0x1bd   : > { %v293_v27 = vsel %vm292_vm8, %v272_v18, %v291_v25 }
 0x1be   : > { %v296_v28 = vsel %vm294_vm9, %v295_v26, %v293_v27 }
 0x1bf   : > { %301 = vrot.lane.b32.xlu2 %v296_v28, %s573_s26 }
 0x213   : > { %v300_v29 = vpop.permute.xlu1 %299 }
 0x214   : > { %306 = vst.msk [vmem:[%s136_s3] sm:$0xff] %vm305_vm10, %v300_v29 }
 0x219   : > { %v302_v30 = vpop.permute.xlu2 %301 }
 0x21a   : > { %307 = vst.msk [vmem:[%s136_s3 + $0x8] sm:$0xff] %vm305_vm10, %v302_v30 }
 0x21b   : > { %528 = shalt.err (!%p525_p4)
}
 0x21c   : > { %s575_s21 = smov 128   ;;  %s576_s24 = smov 8  }
 0x21d   : > { %415 = dma.vmem_to_hbm [thread:$0]  (%p637_p11), %s322_s4, 256, %s324_s5, %s309_s11, %s575_s21, %s575_s21, %s576_s24  }
 0x21e PF: > { %s338_s25 = sand.u32 1, %s555_s6   ;;  %p739_p7 = scmp.ge.s32.totalorder %s567_s9, 2 }
 0x21f   : > { %s339_s17 = scalar_lea.sflag [#allocation4], %s338_s25 }
 0x220   : > { %p422_p5 = pnand %p739_p7, %p641_p12 }
 0x222   : > { %p423_p8 = pneg %p422_p5 }
 0x224   : > { %550 = dma.done.wait (%p423_p8), %s339_s17, 256  }
 0x225   : > { %552 = vsyncadd (%p423_p8), %s339_s17, 4294967040  ;;  %p14_p10 = scmp.ge.s32.totalorder %s612_s12, 4   ;;  %s740_s6 = smov %s559_s7 }
 0x226   : > { %s741_s7 = smov %s563_s8  ;;  %s742_s8 = smov %s624_s15 }
 0x227   : > { %s743_s9 = smov %s612_s12  ;;  %16 = sbr.rel (!%p14_p10) target bundleno = 5 (0x5), region = 69 }
 0x22c   :  { %345 = vsyncpa [#allocation3], 1 }
 0x22d   :  { %347 = vsyncpa [#allocation3 + $0x1], 1 }
 0x22e   :  { %348 = vsyncpa [#allocation4], 1 }
 0x22f   :  { %350 = vsyncpa [#allocation4 + $0x1], 1 }

</bundles_post_ra>
